<compile_context>
chip_gen: v7x
topology: tpu7x:2x2x1
jax: 0.10.0
libtpu: 0.0.40
codegen_flags: <defaults>
</compile_context>

<pallas_src>
import jax
import jax.numpy as jnp
from jax.experimental import pallas as pl
from jax.experimental.pallas import tpu as pltpu

IN_SIZE = 3       # 1 + 1 + 1
H1 = 4
H2 = 3
OUT_SIZE = 1

# Packed-parameter slab layout (flat f32, row-major weights stored as (in, out)).
W1_OFF = 0                       # (IN_SIZE, H1) -> 12
B1_OFF = W1_OFF + IN_SIZE * H1   # (H1,)         -> 4
W2_OFF = B1_OFF + H1             # (H1, H2)      -> 12
B2_OFF = W2_OFF + H1 * H2        # (H2,)         -> 3
W3_OFF = B2_OFF + H2             # (H2, OUT)     -> 3
B3_OFF = W3_OFF + H2 * OUT_SIZE  # (OUT,)        -> 1
PACK_LEN = 64                    # padded; 1-D SMEM f32[64] = 256 B


def value_nn_kernel(w_ref, x_ref, o_ref):
    # w_ref: SMEM f32[PACK_LEN] packed params (resident across grid steps).
    # x_ref: VMEM (IN_SIZE, TB)  -- batch on lanes.
    # o_ref: VMEM (OUT_SIZE, TB) -- lane-dense output block.

    # Input rows as (1, TB) lane vectors.
    x = [x_ref[k:k + 1, :] for k in range(IN_SIZE)]

    # Layer 1: 3 -> 4, ReLU (fully unrolled scalar*vector madds on the VPU).
    h1 = []
    for j in range(H1):
        acc = x[0] * w_ref[W1_OFF + 0 * H1 + j]
        for k in range(1, IN_SIZE):
            acc = acc + x[k] * w_ref[W1_OFF + k * H1 + j]
        acc = acc + w_ref[B1_OFF + j]
        h1.append(jnp.maximum(acc, 0.0))

    # Layer 2: 4 -> 3, ReLU.
    h2 = []
    for j in range(H2):
        acc = h1[0] * w_ref[W2_OFF + 0 * H2 + j]
        for k in range(1, H1):
            acc = acc + h1[k] * w_ref[W2_OFF + k * H2 + j]
        acc = acc + w_ref[B2_OFF + j]
        h2.append(jnp.maximum(acc, 0.0))

    # Layer 3: 3 -> 1 (no activation).
    out = h2[0] * w_ref[W3_OFF + 0]
    for k in range(1, H2):
        out = out + h2[k] * w_ref[W3_OFF + k]
    out = out + w_ref[B3_OFF]

    o_ref[...] = out.astype(o_ref.dtype)


def pack_params(params):
    flat = jnp.concatenate([
        params["w1"].reshape(-1), params["b1"].reshape(-1),
        params["w2"].reshape(-1), params["b2"].reshape(-1),
        params["w3"].reshape(-1), params["b3"].reshape(-1),
    ]).astype(jnp.float32)
    return jnp.pad(flat, (0, PACK_LEN - flat.shape[0]))


def _round_up(n, m):
    return ((n + m - 1) // m) * m


def value_nn_forward(x, params, *, tb=None):
    """x: (B, IN_SIZE) float32. params: dict with weights stored as (in, out)."""
    B = x.shape[0]

    # Batch tile: multiple of 128 (lane axis), big enough to amortize per-step
    # overhead, capped at 8192 (256 KiB f32 input block, double-buffered).
    if tb is None:
        tb = min(8192, _round_up(B, 128))
    tb = _round_up(tb, 128)

    num_blocks = pl.cdiv(B, tb)
    b_pad = num_blocks * tb

    # Layout plumbing in the wrapper: batch -> lanes.
    x_t = x.astype(jnp.float32).T                     # (IN_SIZE, B)
    if b_pad != B:
        x_t = jnp.pad(x_t, ((0, 0), (0, b_pad - B)))  # (IN_SIZE, b_pad)

    w_flat = pack_params(params)                      # (PACK_LEN,) f32 -> SMEM

    out_t = pl.pallas_call(
        value_nn_kernel,
        out_shape=jax.ShapeDtypeStruct((OUT_SIZE, b_pad), jnp.float32),
        grid=(num_blocks,),
        in_specs=[
            # Packed params: whole slab in SMEM, constant index map -> resident.
            pl.BlockSpec((PACK_LEN,), lambda i: (0,),
                         memory_space=pltpu.MemorySpace.SMEM),
            # x: batch-tiled along the lane axis.
            pl.BlockSpec((IN_SIZE, tb), lambda i: (0, i)),
        ],
        out_specs=pl.BlockSpec((OUT_SIZE, tb), lambda i: (0, i)),
        compiler_params=pltpu.CompilerParams(
            dimension_semantics=("parallel",)),
    )(w_flat, x_t)

    return out_t[:, :B].T                             # (B, OUT_SIZE)


def init_params(key):
    """PyTorch nn.Linear-style init (uniform +/- 1/sqrt(fan_in)); weights stored
    transposed vs PyTorch, i.e. (in_features, out_features), so y = x @ W + b."""
    ks = jax.random.split(key, 6)

    def linear(kw, kb, fan_in, fan_out):
        bound = 1.0 / jnp.sqrt(fan_in)
        w = jax.random.uniform(kw, (fan_in, fan_out), jnp.float32, -bound, bound)
        b = jax.random.uniform(kb, (1, fan_out), jnp.float32, -bound, bound)
        return w, b

    w1, b1 = linear(ks[0], ks[1], IN_SIZE, H1)
    w2, b2 = linear(ks[2], ks[3], H1, H2)
    w3, b3 = linear(ks[4], ks[5], H2, OUT_SIZE)
    return dict(w1=w1, b1=b1, w2=w2, b2=b2, w3=w3, b3=b3)


def value_nn_reference(x, p):
    h1 = jnp.maximum(x @ p["w1"] + p["b1"], 0.0)
    h2 = jnp.maximum(h1 @ p["w2"] + p["b2"], 0.0)
    return h2 @ p["w3"] + p["b3"]


if __name__ == "__main__":
    key = jax.random.PRNGKey(0)
    k_param, k_x = jax.random.split(key)

    B = 1000  # not a multiple of the tile -> exercises padding + multi-step grid
    params = init_params(k_param)
    x = jax.random.normal(k_x, (B, IN_SIZE), jnp.float32)

    out = value_nn_forward(x, params, tb=256)  # grid=(4,), pipelined batch tiles
    out = jax.block_until_ready(out)

    ref = value_nn_reference(x, params)
    assert out.shape == (B, OUT_SIZE)
    assert jnp.allclose(out, ref, atol=1e-5, rtol=1e-5), "mismatch vs reference"

    print("KERNEL_OK")
</pallas_src>

<mosaic_0001>
module attributes {stable_mosaic.version = 11 : i64} {
  func.func @value_nn_kernel(%arg0: i32, %arg1: memref<64xf32, #tpu.memory_space<smem>>, %arg2: memref<3x256xf32, #tpu.memory_space<vmem>>, %arg3: memref<1x256xf32, #tpu.memory_space<vmem>>) attributes {dimension_semantics = [#tpu.dimension_semantics<parallel>], iteration_bounds = array<i64: 4>, scalar_prefetch = 0 : i64, scratch_operands = 0 : i64, tpu.core_type = #tpu.core_type<tc>, window_params = [{transform_indices = @transform_0, window_bounds = array<i64: 64>}, {transform_indices = @transform_1, window_bounds = array<i64: 3, 256>}, {transform_indices = @transform_2, window_bounds = array<i64: 1, 256>}]} {
    %c0 = arith.constant 0 : index
    %c0_0 = arith.constant 0 : index
    %0 = vector.load %arg2[%c0, %c0_0] : memref<3x256xf32, #tpu.memory_space<vmem>>, vector<1x256xf32>
    %c1 = arith.constant 1 : index
    %c0_1 = arith.constant 0 : index
    %1 = vector.load %arg2[%c1, %c0_1] : memref<3x256xf32, #tpu.memory_space<vmem>>, vector<1x256xf32>
    %c2 = arith.constant 2 : index
    %c0_2 = arith.constant 0 : index
    %2 = vector.load %arg2[%c2, %c0_2] : memref<3x256xf32, #tpu.memory_space<vmem>>, vector<1x256xf32>
    %c0_3 = arith.constant 0 : index
    %3 = memref.load %arg1[%c0_3] : memref<64xf32, #tpu.memory_space<smem>>
    %4 = vector.broadcast %3 : f32 to vector<1x256xf32>
    %5 = arith.mulf %0, %4 : vector<1x256xf32>
    %c4 = arith.constant 4 : index
    %6 = memref.load %arg1[%c4] : memref<64xf32, #tpu.memory_space<smem>>
    %7 = vector.broadcast %6 : f32 to vector<1x256xf32>
    %8 = arith.mulf %1, %7 : vector<1x256xf32>
    %9 = arith.addf %5, %8 : vector<1x256xf32>
    %c8 = arith.constant 8 : index
    %10 = memref.load %arg1[%c8] : memref<64xf32, #tpu.memory_space<smem>>
    %11 = vector.broadcast %10 : f32 to vector<1x256xf32>
    %12 = arith.mulf %2, %11 : vector<1x256xf32>
    %13 = arith.addf %9, %12 : vector<1x256xf32>
    %c12 = arith.constant 12 : index
    %14 = memref.load %arg1[%c12] : memref<64xf32, #tpu.memory_space<smem>>
    %15 = vector.broadcast %14 : f32 to vector<1x256xf32>
    %16 = arith.addf %13, %15 : vector<1x256xf32>
    %cst = arith.constant 0.000000e+00 : f32
    %17 = vector.broadcast %cst : f32 to vector<1x256xf32>
    %18 = arith.maximumf %16, %17 : vector<1x256xf32>
    %c1_4 = arith.constant 1 : index
    %19 = memref.load %arg1[%c1_4] : memref<64xf32, #tpu.memory_space<smem>>
    %20 = vector.broadcast %19 : f32 to vector<1x256xf32>
    %21 = arith.mulf %0, %20 : vector<1x256xf32>
    %c5 = arith.constant 5 : index
    %22 = memref.load %arg1[%c5] : memref<64xf32, #tpu.memory_space<smem>>
    %23 = vector.broadcast %22 : f32 to vector<1x256xf32>
    %24 = arith.mulf %1, %23 : vector<1x256xf32>
    %25 = arith.addf %21, %24 : vector<1x256xf32>
    %c9 = arith.constant 9 : index
    %26 = memref.load %arg1[%c9] : memref<64xf32, #tpu.memory_space<smem>>
    %27 = vector.broadcast %26 : f32 to vector<1x256xf32>
    %28 = arith.mulf %2, %27 : vector<1x256xf32>
    %29 = arith.addf %25, %28 : vector<1x256xf32>
    %c13 = arith.constant 13 : index
    %30 = memref.load %arg1[%c13] : memref<64xf32, #tpu.memory_space<smem>>
    %31 = vector.broadcast %30 : f32 to vector<1x256xf32>
    %32 = arith.addf %29, %31 : vector<1x256xf32>
    %cst_5 = arith.constant 0.000000e+00 : f32
    %33 = vector.broadcast %cst_5 : f32 to vector<1x256xf32>
    %34 = arith.maximumf %32, %33 : vector<1x256xf32>
    %c2_6 = arith.constant 2 : index
    %35 = memref.load %arg1[%c2_6] : memref<64xf32, #tpu.memory_space<smem>>
    %36 = vector.broadcast %35 : f32 to vector<1x256xf32>
    %37 = arith.mulf %0, %36 : vector<1x256xf32>
    %c6 = arith.constant 6 : index
    %38 = memref.load %arg1[%c6] : memref<64xf32, #tpu.memory_space<smem>>
    %39 = vector.broadcast %38 : f32 to vector<1x256xf32>
    %40 = arith.mulf %1, %39 : vector<1x256xf32>
    %41 = arith.addf %37, %40 : vector<1x256xf32>
    %c10 = arith.constant 10 : index
    %42 = memref.load %arg1[%c10] : memref<64xf32, #tpu.memory_space<smem>>
    %43 = vector.broadcast %42 : f32 to vector<1x256xf32>
    %44 = arith.mulf %2, %43 : vector<1x256xf32>
    %45 = arith.addf %41, %44 : vector<1x256xf32>
    %c14 = arith.constant 14 : index
    %46 = memref.load %arg1[%c14] : memref<64xf32, #tpu.memory_space<smem>>
    %47 = vector.broadcast %46 : f32 to vector<1x256xf32>
    %48 = arith.addf %45, %47 : vector<1x256xf32>
    %cst_7 = arith.constant 0.000000e+00 : f32
    %49 = vector.broadcast %cst_7 : f32 to vector<1x256xf32>
    %50 = arith.maximumf %48, %49 : vector<1x256xf32>
    %c3 = arith.constant 3 : index
    %51 = memref.load %arg1[%c3] : memref<64xf32, #tpu.memory_space<smem>>
    %52 = vector.broadcast %51 : f32 to vector<1x256xf32>
    %53 = arith.mulf %0, %52 : vector<1x256xf32>
    %c7 = arith.constant 7 : index
    %54 = memref.load %arg1[%c7] : memref<64xf32, #tpu.memory_space<smem>>
    %55 = vector.broadcast %54 : f32 to vector<1x256xf32>
    %56 = arith.mulf %1, %55 : vector<1x256xf32>
    %57 = arith.addf %53, %56 : vector<1x256xf32>
    %c11 = arith.constant 11 : index
    %58 = memref.load %arg1[%c11] : memref<64xf32, #tpu.memory_space<smem>>
    %59 = vector.broadcast %58 : f32 to vector<1x256xf32>
    %60 = arith.mulf %2, %59 : vector<1x256xf32>
    %61 = arith.addf %57, %60 : vector<1x256xf32>
    %c15 = arith.constant 15 : index
    %62 = memref.load %arg1[%c15] : memref<64xf32, #tpu.memory_space<smem>>
    %63 = vector.broadcast %62 : f32 to vector<1x256xf32>
    %64 = arith.addf %61, %63 : vector<1x256xf32>
    %cst_8 = arith.constant 0.000000e+00 : f32
    %65 = vector.broadcast %cst_8 : f32 to vector<1x256xf32>
    %66 = arith.maximumf %64, %65 : vector<1x256xf32>
    %c16 = arith.constant 16 : index
    %67 = memref.load %arg1[%c16] : memref<64xf32, #tpu.memory_space<smem>>
    %68 = vector.broadcast %67 : f32 to vector<1x256xf32>
    %69 = arith.mulf %18, %68 : vector<1x256xf32>
    %c19 = arith.constant 19 : index
    %70 = memref.load %arg1[%c19] : memref<64xf32, #tpu.memory_space<smem>>
    %71 = vector.broadcast %70 : f32 to vector<1x256xf32>
    %72 = arith.mulf %34, %71 : vector<1x256xf32>
    %73 = arith.addf %69, %72 : vector<1x256xf32>
    %c22 = arith.constant 22 : index
    %74 = memref.load %arg1[%c22] : memref<64xf32, #tpu.memory_space<smem>>
    %75 = vector.broadcast %74 : f32 to vector<1x256xf32>
    %76 = arith.mulf %50, %75 : vector<1x256xf32>
    %77 = arith.addf %73, %76 : vector<1x256xf32>
    %c25 = arith.constant 25 : index
    %78 = memref.load %arg1[%c25] : memref<64xf32, #tpu.memory_space<smem>>
    %79 = vector.broadcast %78 : f32 to vector<1x256xf32>
    %80 = arith.mulf %66, %79 : vector<1x256xf32>
    %81 = arith.addf %77, %80 : vector<1x256xf32>
    %c28 = arith.constant 28 : index
    %82 = memref.load %arg1[%c28] : memref<64xf32, #tpu.memory_space<smem>>
    %83 = vector.broadcast %82 : f32 to vector<1x256xf32>
    %84 = arith.addf %81, %83 : vector<1x256xf32>
    %cst_9 = arith.constant 0.000000e+00 : f32
    %85 = vector.broadcast %cst_9 : f32 to vector<1x256xf32>
    %86 = arith.maximumf %84, %85 : vector<1x256xf32>
    %c17 = arith.constant 17 : index
    %87 = memref.load %arg1[%c17] : memref<64xf32, #tpu.memory_space<smem>>
    %88 = vector.broadcast %87 : f32 to vector<1x256xf32>
    %89 = arith.mulf %18, %88 : vector<1x256xf32>
    %c20 = arith.constant 20 : index
    %90 = memref.load %arg1[%c20] : memref<64xf32, #tpu.memory_space<smem>>
    %91 = vector.broadcast %90 : f32 to vector<1x256xf32>
    %92 = arith.mulf %34, %91 : vector<1x256xf32>
    %93 = arith.addf %89, %92 : vector<1x256xf32>
    %c23 = arith.constant 23 : index
    %94 = memref.load %arg1[%c23] : memref<64xf32, #tpu.memory_space<smem>>
    %95 = vector.broadcast %94 : f32 to vector<1x256xf32>
    %96 = arith.mulf %50, %95 : vector<1x256xf32>
    %97 = arith.addf %93, %96 : vector<1x256xf32>
    %c26 = arith.constant 26 : index
    %98 = memref.load %arg1[%c26] : memref<64xf32, #tpu.memory_space<smem>>
    %99 = vector.broadcast %98 : f32 to vector<1x256xf32>
    %100 = arith.mulf %66, %99 : vector<1x256xf32>
    %101 = arith.addf %97, %100 : vector<1x256xf32>
    %c29 = arith.constant 29 : index
    %102 = memref.load %arg1[%c29] : memref<64xf32, #tpu.memory_space<smem>>
    %103 = vector.broadcast %102 : f32 to vector<1x256xf32>
    %104 = arith.addf %101, %103 : vector<1x256xf32>
    %cst_10 = arith.constant 0.000000e+00 : f32
    %105 = vector.broadcast %cst_10 : f32 to vector<1x256xf32>
    %106 = arith.maximumf %104, %105 : vector<1x256xf32>
    %c18 = arith.constant 18 : index
    %107 = memref.load %arg1[%c18] : memref<64xf32, #tpu.memory_space<smem>>
    %108 = vector.broadcast %107 : f32 to vector<1x256xf32>
    %109 = arith.mulf %18, %108 : vector<1x256xf32>
    %c21 = arith.constant 21 : index
    %110 = memref.load %arg1[%c21] : memref<64xf32, #tpu.memory_space<smem>>
    %111 = vector.broadcast %110 : f32 to vector<1x256xf32>
    %112 = arith.mulf %34, %111 : vector<1x256xf32>
    %113 = arith.addf %109, %112 : vector<1x256xf32>
    %c24 = arith.constant 24 : index
    %114 = memref.load %arg1[%c24] : memref<64xf32, #tpu.memory_space<smem>>
    %115 = vector.broadcast %114 : f32 to vector<1x256xf32>
    %116 = arith.mulf %50, %115 : vector<1x256xf32>
    %117 = arith.addf %113, %116 : vector<1x256xf32>
    %c27 = arith.constant 27 : index
    %118 = memref.load %arg1[%c27] : memref<64xf32, #tpu.memory_space<smem>>
    %119 = vector.broadcast %118 : f32 to vector<1x256xf32>
    %120 = arith.mulf %66, %119 : vector<1x256xf32>
    %121 = arith.addf %117, %120 : vector<1x256xf32>
    %c30 = arith.constant 30 : index
    %122 = memref.load %arg1[%c30] : memref<64xf32, #tpu.memory_space<smem>>
    %123 = vector.broadcast %122 : f32 to vector<1x256xf32>
    %124 = arith.addf %121, %123 : vector<1x256xf32>
    %cst_11 = arith.constant 0.000000e+00 : f32
    %125 = vector.broadcast %cst_11 : f32 to vector<1x256xf32>
    %126 = arith.maximumf %124, %125 : vector<1x256xf32>
    %c31 = arith.constant 31 : index
    %127 = memref.load %arg1[%c31] : memref<64xf32, #tpu.memory_space<smem>>
    %128 = vector.broadcast %127 : f32 to vector<1x256xf32>
    %129 = arith.mulf %86, %128 : vector<1x256xf32>
    %c32 = arith.constant 32 : index
    %130 = memref.load %arg1[%c32] : memref<64xf32, #tpu.memory_space<smem>>
    %131 = vector.broadcast %130 : f32 to vector<1x256xf32>
    %132 = arith.mulf %106, %131 : vector<1x256xf32>
    %133 = arith.addf %129, %132 : vector<1x256xf32>
    %c33 = arith.constant 33 : index
    %134 = memref.load %arg1[%c33] : memref<64xf32, #tpu.memory_space<smem>>
    %135 = vector.broadcast %134 : f32 to vector<1x256xf32>
    %136 = arith.mulf %126, %135 : vector<1x256xf32>
    %137 = arith.addf %133, %136 : vector<1x256xf32>
    %c34 = arith.constant 34 : index
    %138 = memref.load %arg1[%c34] : memref<64xf32, #tpu.memory_space<smem>>
    %139 = vector.broadcast %138 : f32 to vector<1x256xf32>
    %140 = arith.addf %137, %139 : vector<1x256xf32>
    %c0_12 = arith.constant 0 : index
    %c0_13 = arith.constant 0 : index
    %141 = vector.load %arg3[%c0_12, %c0_13] : memref<1x256xf32, #tpu.memory_space<vmem>>, vector<1x256xf32>
    tpu.vector_store %arg3[%c0_12, %c0_13], %140 {strides = array<i32>} : memref<1x256xf32, #tpu.memory_space<vmem>>, vector<1x256xf32>,
    return
  }
  func.func @transform_0(%arg0: i32) -> i32 {
    %c0_i32 = arith.constant 0 : i32
    %c0_i32_0 = arith.constant 0 : i32
    return %c0_i32 : i32
  }
  func.func @transform_1(%arg0: i32) -> (i32, i32) {
    %c0_i32 = arith.constant 0 : i32
    %c0_i32_0 = arith.constant 0 : i32
    return %c0_i32, %arg0 : i32, i32
  }
  func.func @transform_2(%arg0: i32) -> (i32, i32) {
    %c0_i32 = arith.constant 0 : i32
    %c0_i32_0 = arith.constant 0 : i32
    return %c0_i32, %arg0 : i32, i32
  }
}

</mosaic_0001>

<bundles_post_ra>
// kernel: tpu_custom_call.1
= control target key start
LH: loop header
LB: loop body
LE: loop exit
PB: predicated region body
PF: predicated region fallthrough
CT: control target
= control target key end

     0   :  { %7 = vsyncpa [#allocation5], 0  ;;  %s938_s0 = inlined_call_operand.hbm [shape: f32[64], index: 0, kind: input, shape index: {}]   ;;  %s939_s1 = inlined_call_operand.hbm [shape: f32[3,1024], index: 1, kind: input, shape index: {}]   ;;  %s940_s2 = inlined_call_operand.hbm [shape: f32[1,1024], index: 2, kind: output, shape index: {}]  }
   0x1   :  { %8 = vsyncpa [#allocation3], 0 }
   0x2   :  { %10 = vsyncpa [#allocation3 + $0x1], 0 }
   0x3   :  { %11 = vsyncpa [#allocation4], 0 }
   0x4   :  { %13 = vsyncpa [#allocation4 + $0x1], 0  ;;  %s656_s9 = smov 0   ;;  %s658_s10 = smov 0  }
   0x5   :  { %s660_s11 = smov 0   ;;  %s662_s12 = smov 0  }
   0x6 LB: > { %s677_s13 = sadd.s32 4294967295, %s636_s12   ;;  %s412_s14 = sadd.s32 4294967294, %s636_s12   ;;  %s636_s12 = sphi %s662_s12, %s960_s12   ;;  %s632_s11 = sphi %s660_s11, %s959_s11   ;;  %s628_s10 = sphi %s658_s10, %s958_s10   ;;  %s624_s9 = sphi %s656_s9, %s957_s9  }
   0x7   : > { %p60_p0 = scmp.ne.s32.totalorder %s628_s10, %s624_s9  ;;  %p941_p1 = scmp.eq.s32.totalorder %s677_s13, 0 }
   0x8   : > { %p90_p3 = scmp.eq.s32.totalorder %s412_s14, 3  ;;  %p413_p5 = scmp.ge.s32.totalorder %s636_s12, 1 }
   0x9   : > { %p686_p4 = por %p941_p1, %p60_p0  ;;  %p97_p7 = scmp.lt.s32.totalorder %s636_s12, 5 }
   0xa   : > { %p691_p6 = por %p90_p3, %p60_p0  ;;  %s701_s18 = sadd.s32 1, %s636_s12  }
   0xb   : > { %s944_s15 = scalar_select %p686_p4, 1, 0 }
   0xc   : > { %s945_s16 = scalar_select %p691_p6, 1, 0 }
   0xd   : > { %p696_p8 = pnand %p413_p5, %p97_p7  ;;  %s44_s19 = ssub.s32 %s636_s12, %s701_s18 }
   0xe   : > { %s47_s20 = sadd.s32 1, %s632_s11  ;;  %p714_p11 = scmp.eq.s32.totalorder %s44_s19, 0 }
   0xf   : > { %p474_p9 = pneg %p696_p8  ;;  %p54_p12 = scmp.ne.s32.totalorder %s632_s11, %s628_s10 }
  0x10   : > { %p55_p13 = scmp.eq.s32.totalorder %s636_s12, 0  ;;  %p487_p0 = scmp.lt.s32.totalorder %s636_s12, 4 }
  0x11   : > { %p710_p10 = pnand %p474_p9, %p941_p1  ;;  %s523_s25 = scalar_lea.hbm %s938_s0, 16 }
  0x12   : > { %p524_p3 = scmp.ne.s32.totalorder %s938_s0, %s523_s25  ;;  %p530_p1 = scmp.lt.u32.totalorder %s523_s25, %s938_s0 }
  0x13   : > { %p525_p5 = pneg %p710_p10 }
  0x15   : > { %p526_p7 = pnand %p525_p5, %p524_p3 }
  0x17   : > { %p527_p9 = pneg %p526_p7 }
  0x19   : > { %p532_p2 = pnand %p530_p1, %p527_p9 }
  0x1b   : > { %535 = shalt.err (!%p532_p2)
}
  0x1c   : > { %s638_s30 = smov [#allocation2]   ;;  %p56_p1 = por %p55_p13, %p54_p12 }
  0x1d   : > { %477 = dma.hbm_to_smem (!%p710_p10), %s938_s0, 16, %s638_s30, [#allocation5]  }
  0x1e   : > { %s741_s5 = scalar_select %p714_p11, %s632_s11, %s47_s20  }
  0x1f   : > { %p949_p2 = scmp.eq.s32.totalorder %s677_s13, 3  ;;  %s119_s7 = sand.u32 1, %s632_s11  }
  0x20   : > { %s464_s8 = sshll.u32 %s636_s12, 7  ;;  %s416_s14 = sshll.u32 %s119_s7, 3 }
  0x21   : > { %p753_p3 = por %p949_p2, %p54_p12  ;;  %s762_s23 = scalar_lea.hbm %s939_s1, %s464_s8 }
  0x22   : > { %s123_s20 = scalar_lea.vmem [#allocation6], %s416_s14  ;;  %p766_p10 = pnand %p487_p0, %p56_p1 }
  0x23   : > { %s950_s6 = scalar_select %p753_p3, 1, 0 }
  0x24   : > { %s131_s22 = sshll.u32 %s123_s20, 4  ;;  %s120_s25 = scalar_lea.sflag [#allocation3], %s119_s7  ;;  %s770_s22 = int_to_ptr.vmem [resolvable:$true] %s131_s22 }
  0x25   : > { %s536_s26 = scalar_lea.hbm %s762_s23, 128  ;;  %p538_p12 = pneg %p766_p10 }
  0x26   : > { %p537_p11 = scmp.ne.s32.totalorder %s762_s23, %s536_s26  ;;  %s541_s29 = scalar_lea.hbm %s939_s1, 512 }
  0x27   : > { %p542_p0 = scmp.lt.u32.totalorder %s762_s23, %s939_s1  ;;  %p543_p7 = scmp.lt.u32.totalorder %s541_s29, %s536_s26 }
  0x28   : > { %p539_p13 = pnand %p538_p12, %p537_p11  ;;  %p545_p1 = scmp.lt.u32.totalorder %s536_s26, %s762_s23 }
  0x29   : > { %p544_p9 = por %p543_p7, %p542_p0 }
  0x2a   : > { %p540_p5 = pneg %p539_p13 }
  0x2b   : > { %p546_p2 = por %p545_p1, %p544_p9 }
  0x2d   : > { %p547_p6 = pnand %p546_p2, %p540_p5 }
  0x2f   : > { %550 = shalt.err (!%p547_p6)
}
  0x30   : > { %s551_s4 = scalar_lea.vmem %s770_s22, 128  ;;  %s639_s7 = smov [#allocation6]  }
  0x31   : > { %p552_p11 = scmp.ne.s32.totalorder %s770_s22, %s551_s4  ;;  %s556_s8 = sshll.u32 %s639_s7, 4  ;;  %s557_s8 = int_to_ptr.vmem [resolvable:$false] %s556_s8 }
  0x32   : > { %s558_s14 = scalar_lea.vmem %s557_s8, 256  ;;  %p559_p4 = scmp.lt.s32.totalorder %s770_s22, %s557_s8 }
  0x33   : > { %p554_p13 = pnand %p552_p11, %p538_p12  ;;  %p560_p0 = scmp.lt.s32.totalorder %s558_s14, %s551_s4 }
  0x35   : > { %p555_p3 = pneg %p554_p13  ;;  %p561_p7 = por %p560_p0, %p559_p4 }
  0x37   : > { %p562_p9 = pnand %p561_p7, %p555_p3 }
  0x39   : > { %565 = shalt.err (!%p562_p9)
}
  0x3a   : > { %481 = dma.hbm_to_vmem [thread:$0]  (!%p766_p10), %s762_s23, 128, %s770_s22, %s120_s25  }
  0x3b   : > { %140 = sbr.rel (%p696_p8) target bundleno = 128 (0x80), region = 28  ;;  %p952_p6 = scmp.eq.s32.totalorder (!%p696_p8), %s677_s13, 0 }
  0x42   : > { %611 = dma.done.wait (%p952_p6), [#allocation5], 16   ;;  %p953_p12 = pmov %p952_p6 }
  0x43   : > { %s804_s19 = sand.u32 1, %s628_s10   ;;  %p954_p4 = scmp.ne.s32.totalorder %s944_s15, 0 }
  0x44   : > { %613 = vsyncadd (%p953_p12), [#allocation5], 4294967280  ;;  %s421_s21 = sshll.u32 %s804_s19, 3  ;;  %s147_s20 = scalar_lea.sflag [#allocation3], %s804_s19 }
  0x45   : > { %s150_s24 = scalar_lea.vmem [#allocation6], %s421_s21 }
  0x46   : > { %615 = dma.done.wait (%p954_p4), %s147_s20, 128  }
  0x47   : > { %617 = vsyncadd (%p954_p4), %s147_s20, 4294967168 }
  0x48   : > { %155 = sfence }
  0x49   : > { %s179_s17 = sld [smem:[#allocation2]]  ;;  %s425_s23 = sld [smem:[#allocation2 + $0x4]]  ;;  %v174_v0 = vld [vmem:[%s150_s24] ss:$4 sm:$0x3] }
  0x4a   : > { %s426_s22 = sld [smem:[#allocation2 + $0x8]]  ;;  %v423_v1 = vld [vmem:[%s150_s24 + $0x1] ss:$4 sm:$0x3]  ;;  %s812_s25 = sld [smem:[#allocation2 + $0xc]] }
  0x4b   : > { %s428_s26 = sld [smem:[#allocation2 + $0x1]]  ;;  %v424_v2 = vld [vmem:[%s150_s24 + $0x2] ss:$4 sm:$0x3]  ;;  %s429_s27 = sld [smem:[#allocation2 + $0x5]] }
  0x4c   : > { %s430_s28 = sld [smem:[#allocation2 + $0x9]]  ;;  %s814_s29 = sld [smem:[#allocation2 + $0xd]] }
  0x4d   : > { %s432_s30 = sld [smem:[#allocation2 + $0x2]]  ;;  %s816_s3 = sld [smem:[#allocation2 + $0x6]] }
  0x4e   : > { %s818_s15 = sld [smem:[#allocation2 + $0xa]]  ;;  %s820_s4 = sld [smem:[#allocation2 + $0xe]] }
  0x4f   : > { %v180_v3 = vstv %s179_s17  ;;  %v183_v5 = vstv %s425_s23  ;;  %s822_s7 = sld [smem:[#allocation2 + $0x3]]  ;;  %s824_s8 = sld [smem:[#allocation2 + $0x7]] }
  0x50   : > { %v181_v4 = vmul.f32 %v180_v3, %v174_v0  ;;  %v184_v6 = vmul.f32 %v423_v1, %v183_v5  ;;  %v187_v7 = vstv %s426_s22  ;;  %s826_s14 = sld [smem:[#allocation2 + $0xb]]  ;;  %s828_s21 = sld [smem:[#allocation2 + $0xf]]  ;;  %v191_v14 = vstv %s812_s25 }
  0x51   : > { %v188_v8 = vmul.f32 %v424_v2, %v187_v7  ;;  %v195_v9 = vstv %s428_s26  ;;  %s830_s20 = sld [smem:[#allocation2 + $0x10]]  ;;  %v198_v12 = vstv %s429_s27  ;;  %s832_s24 = sld [smem:[#allocation2 + $0x13]] }
  0x52   : > { %v185_v10 = vadd.f32 %v184_v6, %v181_v4  ;;  %v196_v11 = vmul.f32 %v195_v9, %v174_v0  ;;  %v202_v13 = vstv %s430_s28  ;;  %s834_s17 = sld [smem:[#allocation2 + $0x16]]  ;;  %v199_v15 = vmul.f32 %v423_v1, %v198_v12  ;;  %s837_s23 = sld [smem:[#allocation2 + $0x19]] }
  0x53   : > { %v203_v16 = vmul.f32 %v424_v2, %v202_v13  ;;  %v210_v17 = vstv %s432_s30  ;;  %v213_v20 = vstv %s816_s3  ;;  %s841_s22 = sld [smem:[#allocation2 + $0x11]]  ;;  %s843_s26 = sld [smem:[#allocation2 + $0x14]]  ;;  %v206_v23 = vstv %s814_s29 }
  0x54   : > { %v189_v18 = vadd.f32 %v188_v8, %v185_v10  ;;  %v211_v19 = vmul.f32 %v210_v17, %v174_v0  ;;  %v217_v21 = vstv %s818_s15  ;;  %v200_v22 = vadd.f32 %v199_v15, %v196_v11  ;;  %s846_s25 = sld [smem:[#allocation2 + $0x17]]  ;;  %s851_s27 = sld [smem:[#allocation2 + $0x1a]] }
  0x55   : > { %v214_v24 = vmul.f32 %v423_v1, %v213_v20  ;;  %v218_v25 = vmul.f32 %v424_v2, %v217_v21  ;;  %v225_v27 = vstv %s822_s7  ;;  %v228_v28 = vstv %s824_s8  ;;  %s853_s28 = sld [smem:[#allocation2 + $0x12]]  ;;  %s855_s29 = sld [smem:[#allocation2 + $0x15]] }
  0x56   : > { %v192_v26 = vadd.f32 %v191_v14, %v189_v18  ;;  %v232_v29 = vstv %s826_s14  ;;  %v204_v30 = vadd.f32 %v203_v16, %v200_v22  ;;  %v226_v32 = vmul.f32 %v225_v27, %v174_v0  ;;  %s857_s30 = sld [smem:[#allocation2 + $0x18]]  ;;  %s861_s3 = sld [smem:[#allocation2 + $0x1b]] }
  0x57   : > { %v215_v31 = vadd.f32 %v214_v24, %v211_v19  ;;  %v229_v33 = vmul.f32 %v423_v1, %v228_v28  ;;  %v221_v35 = vstv %s820_s4  ;;  %v233_v36 = vmul.f32 %v424_v2, %v232_v29  ;;  %s866_s15 = sld [smem:[#allocation2 + $0x1c]]  ;;  %s869_s4 = sld [smem:[#allocation2 + $0x1d]] }
  0x58   : > { %v193_v34 = vmax.f32 %v192_v26, 0.0  ;;  %v240_v37 = vstv %s830_s20  ;;  %v207_v38 = vadd.f32 %v206_v23, %v204_v30  ;;  %v236_v41 = vstv %s828_s21  ;;  %s874_s7 = sld [smem:[#allocation2 + $0x1e]]  ;;  %s880_s8 = sld [smem:[#allocation2 + $0x1f]] }
  0x59   : > { %v219_v39 = vadd.f32 %v218_v25, %v215_v31  ;;  %v230_v40 = vadd.f32 %v229_v33, %v226_v32  ;;  %v243_v43 = vstv %s832_s24  ;;  %v247_v44 = vstv %s834_s17  ;;  %s882_s14 = sld [smem:[#allocation2 + $0x20]]  ;;  %s457_s21 = sld [smem:[#allocation2 + $0x21]] }
  0x5a   : > { %v241_v42 = vmul.f32 %v240_v37, %v193_v34  ;;  %v208_v45 = vmax.f32 %v207_v38, 0.0  ;;  %v259_v48 = vstv %s841_s22  ;;  %v251_v49 = vstv %s837_s23  ;;  %s458_s20 = sld [smem:[#allocation2 + $0x22]]  ;;  %s422_s24 = sshll.u32 %s804_s19, 1 }
  0x5b   : > { %v222_v46 = vadd.f32 %v221_v35, %v219_v39  ;;  %v234_v47 = vadd.f32 %v233_v36, %v230_v40  ;;  %v260_v50 = vmul.f32 %v259_v48, %v193_v34  ;;  %v262_v51 = vstv %s843_s26  ;;  %s465_s17 = sshll.u32 %s677_s13, 5  ;;  %s171_s23 = scalar_lea.vmem [#allocation7], %s422_s24 }
  0x5c   : > { %v266_v52 = vstv %s846_s25  ;;  %v244_v55 = vmul.f32 %v243_v43, %v208_v45  ;;  %v263_v56 = vmul.f32 %v262_v51, %v208_v45  ;;  %v270_v57 = vstv %s851_s27  ;;  %s330_s22 = sshll.u32 %s171_s23, 4  ;;  %s895_s27 = scalar_lea.hbm %s940_s2, %s465_s17  ;;  %s897_s22 = int_to_ptr.vmem [resolvable:$true] %s330_s22 }
  0x5d   : > { %v223_v53 = vmax.f32 %v222_v46, 0.0  ;;  %v237_v54 = vadd.f32 %v236_v41, %v234_v47  ;;  %v278_v58 = vstv %s853_s28  ;;  %v281_v59 = vstv %s855_s29  ;;  %s316_s28 = scalar_lea.sflag [#allocation4], %s804_s19  ;;  %s566_s29 = scalar_lea.vmem %s897_s22, 32 }
  0x5e   : > { %v285_v60 = vstv %s857_s30  ;;  %v245_v62 = vadd.f32 %v244_v55, %v241_v42  ;;  %v264_v0 = vadd.f32 %v263_v56, %v260_v50  ;;  %v279_v2 = vmul.f32 %v278_v58, %v193_v34  ;;  %p567_p8 = scmp.ne.s32.totalorder %s897_s22, %s566_s29  ;;  %p955_p3 = scmp.ne.s32.totalorder %s950_s6, 0 }
  0x5f   : > { %v238_v61 = vmax.f32 %v237_v54, 0.0  ;;  %v248_v63 = vmul.f32 %v247_v44, %v223_v53  ;;  %v267_v1 = vmul.f32 %v266_v52, %v223_v53  ;;  %v282_v3 = vmul.f32 %v281_v59, %v208_v45  ;;  %s640_s13 = smov [#allocation7]  }
  0x60   : > { %v286_v4 = vmul.f32 %v285_v60, %v223_v53  ;;  %v289_v8 = vstv %s861_s3  ;;  %v255_v9 = vstv %s866_s15  ;;  %v274_v14 = vstv %s869_s4  ;;  %p568_p10 = pnand %p567_p8, %p955_p3  ;;  %s570_s30 = sshll.u32 %s640_s13, 4  ;;  %s571_s30 = int_to_ptr.vmem [resolvable:$false] %s570_s30 }
  0x61   : > { %v249_v5 = vadd.f32 %v248_v63, %v245_v62  ;;  %v252_v6 = vmul.f32 %v251_v49, %v238_v61  ;;  %v271_v7 = vmul.f32 %v270_v57, %v238_v61  ;;  %v268_v10 = vadd.f32 %v267_v1, %v264_v0  ;;  %s572_s3 = scalar_lea.vmem %s571_s30, 64  ;;  %p573_p1 = scmp.lt.s32.totalorder %s897_s22, %s571_s30 }
  0x62   : > { %v283_v11 = vadd.f32 %v282_v3, %v279_v2  ;;  %v290_v12 = vmul.f32 %v289_v8, %v238_v61  ;;  %v293_v18 = vstv %s874_s7  ;;  %v297_v21 = vstv %s880_s8  ;;  %p569_p5 = pneg %p568_p10  ;;  %p574_p2 = scmp.lt.s32.totalorder %s572_s3, %s566_s29 }
  0x63   : > { %v253_v13 = vadd.f32 %v252_v6, %v249_v5  ;;  %v272_v15 = vadd.f32 %v271_v7, %v268_v10  ;;  %v300_v23 = vstv %s882_s14  ;;  %v304_v27 = vstv %s457_s21 }
  0x64   : > { %v287_v16 = vadd.f32 %v286_v4, %v283_v11  ;;  %v310_v30 = vlaneseq  ;;  %v308_v33 = vstv %s458_s20  ;;  %p575_p11 = por %p574_p2, %p573_p1 }
  0x65   : > { %v256_v17 = vadd.f32 %v255_v9, %v253_v13  ;;  %v275_v19 = vadd.f32 %v274_v14, %v272_v15 }
  0x66   : > { %v291_v20 = vadd.f32 %v290_v12, %v287_v16  ;;  %vm312_vm0 = vcmp.lt.s32.totalorder %v310_v30, 256  ;;  %p576_p13 = pnand %p575_p11, %p569_p5 }
  0x67   : > { %v257_v22 = vmax.f32 %v256_v17, 0.0  ;;  %v276_v24 = vmax.f32 %v275_v19, 0.0 }
  0x68   : > { %v294_v25 = vadd.f32 %v293_v18, %v291_v20 }
  0x69   : > { %v298_v26 = vmul.f32 %v297_v21, %v257_v22  ;;  %v301_v29 = vmul.f32 %v300_v23, %v276_v24 }
  0x6a   : > { %v295_v28 = vmax.f32 %v294_v25, 0.0 }
  0x6b   : > { %v302_v31 = vadd.f32 %v301_v29, %v298_v26 }
  0x6c   : > { %v305_v32 = vmul.f32 %v304_v27, %v295_v28 }
  0x6e   : > { %v306_v34 = vadd.f32 %v305_v32, %v302_v31 }
  0x70   : > { %v309_v35 = vadd.f32 %v308_v33, %v306_v34 }
  0x72   : > { %314 = vst.msk [vmem:[%s171_s23] sm:$0x3] %vm312_vm0, %v309_v35 }
  0x73   : > { %579 = shalt.err (!%p576_p13)
}
  0x74   : > { %s580_s19 = scalar_lea.hbm %s895_s27, 32  ;;  %s584_s7 = scalar_lea.hbm %s940_s2, 128 }
  0x75   : > { %p581_p0 = scmp.ne.s32.totalorder %s895_s27, %s580_s19  ;;  %p585_p6 = scmp.lt.u32.totalorder %s895_s27, %s940_s2 }
  0x76   : > { %p586_p12 = scmp.lt.u32.totalorder %s584_s7, %s580_s19  ;;  %p588_p8 = scmp.lt.u32.totalorder %s580_s19, %s895_s27 }
  0x77   : > { %p582_p7 = pnand %p581_p0, %p955_p3 }
  0x78   : > { %p587_p4 = por %p586_p12, %p585_p6 }
  0x79   : > { %p583_p9 = pneg %p582_p7 }
  0x7a   : > { %p589_p10 = por %p588_p8, %p587_p4 }
  0x7c   : > { %p590_p5 = pnand %p589_p10, %p583_p9 }
  0x7e   : > { %593 = shalt.err (!%p590_p5)
}
  0x7f   : > { %472 = dma.vmem_to_hbm [thread:$0]  (%p955_p3), %s897_s22, 32, %s895_s27, %s316_s28  }
  0x80 PF: > { %p489_p1 = scmp.ge.s32.totalorder %s636_s12, 2  ;;  %s342_s21 = sand.u32 1, %s624_s9  }
  0x81   : > { %p956_p2 = scmp.ne.s32.totalorder %s945_s16, 0  ;;  %s343_s20 = scalar_lea.sflag [#allocation4], %s342_s21 }
  0x83   : > { %p483_p11 = pnand %p489_p1, %p956_p2 }
  0x85   : > { %619 = dma.done.wait (!%p483_p11), %s343_s20, 32  }
  0x86   : > { %621 = vsyncadd (!%p483_p11), %s343_s20, 4294967264  ;;  %p16_p13 = scmp.ge.s32.totalorder %s701_s18, 6   ;;  %s957_s9 = smov %s628_s10 }
  0x87   : > { %s958_s10 = smov %s632_s11  ;;  %s959_s11 = smov %s741_s5 }
  0x88   : > { %s960_s12 = smov %s701_s18  ;;  %18 = sbr.rel (!%p16_p13) target bundleno = 6 (0x6), region = 80 }
  0x8f   :  { %348 = vsyncpa [#allocation3], 1 }
  0x90   :  { %350 = vsyncpa [#allocation3 + $0x1], 1 }
  0x91   :  { %351 = vsyncpa [#allocation4], 1 }
  0x92   :  { %353 = vsyncpa [#allocation4 + $0x1], 1 }
  0x93   :  { %354 = vsyncpa [#allocation5], 1 }
  0x94   :  { %356 = vsyncpa [#allocation5 + $0x1], 1 }

</bundles_post_ra>
